<compile_context>
chip_gen: v6e
topology: v6e:2x2x1
jax: 0.10.0
libtpu: 0.0.40
codegen_flags: <defaults>
</compile_context>

<pallas_src>
import jax
import jax.numpy as jnp
from jax.experimental import pallas as pl
from jax.experimental.pallas import tpu as pltpu


def adapter_kernel(x_ref, w1t_ref, w2t_ref, o_ref):
    # x_ref:   (tm, feat)   tile of the (possibly row-packed) batch
    # w1t_ref: (feat, hid)  = (block-diag of) W1.T  (resident every step)
    # w2t_ref: (hid, feat)  = (block-diag of) W2.T  (resident every step)
    # o_ref:   (tm, feat)
    h = jnp.dot(x_ref[...], w1t_ref[...], preferred_element_type=jnp.float32)
    h = jnp.maximum(h, 0.0)                      # ReLU on the f32 accumulator
    y = jnp.dot(h.astype(w2t_ref.dtype), w2t_ref[...],
                preferred_element_type=jnp.float32)
    y = jnp.maximum(y, 0.0)                      # ReLU on the f32 accumulator
    o_ref[...] = y.astype(o_ref.dtype)           # cast to output dtype last


def _pick_tm(n_rows, feat, in_dsize, out_dsize, desired=1024):
    """Largest sensible batch tile: multiple of 8, fits a conservative VMEM
    budget (double-buffered x + out tiles), and leaves >=2 grid steps when the
    batch permits (so v7x's two TensorCores can both be used)."""
    budget = 8 * 1024 * 1024                     # well under scoped VMEM on all gens
    per_row = 2 * feat * (in_dsize + out_dsize)  # x + out, double-buffered
    cap = max(8, (budget // per_row) // 8 * 8)
    tm = min(desired, cap)
    if n_rows >= 16:
        tm = min(tm, max(8, (n_rows // 2) // 8 * 8))   # keep >=2 grid steps
    tm = min(tm, ((n_rows + 7) // 8) * 8)
    return max(8, tm)


def adapter_forward(x, w1, w2, *, compute_dtype=None, tm=None):
    """x: (B, c_in); w1: (hidden, c_in); w2: (c_in, hidden). Returns (B, c_in)
    in x.dtype. compute_dtype controls the MXU input precision (accumulation
    is always f32); default = x.dtype (exact semantics)."""
    B, c_in = x.shape
    hidden = w1.shape[0]
    assert w1.shape == (hidden, c_in) and w2.shape == (c_in, hidden)
    out_dtype = x.dtype
    if compute_dtype is None:
        compute_dtype = x.dtype

    xc = x.astype(compute_dtype)
    w1t = w1.T.astype(compute_dtype)   # (c_in, hidden)
    w2t = w2.T.astype(compute_dtype)   # (hidden, c_in)

    # Lane-dense packing: if c_in < 128, pack `pack` batch rows per 128-lane
    # vreg row and use block-diagonal weights. Numerically exact (extra zeros).
    pack = 1
    if c_in < 128 and 128 % c_in == 0 and B % (128 // c_in) == 0:
        pack = 128 // c_in
    if pack > 1:
        xc = xc.reshape(B // pack, pack * c_in)
        eye = jnp.eye(pack, dtype=compute_dtype)
        w1t = jnp.kron(eye, w1t)       # (pack*c_in, pack*hidden)
        w2t = jnp.kron(eye, w2t)       # (pack*hidden, pack*c_in)

    n_rows, feat = xc.shape
    hid = w1t.shape[1]

    in_dsize = jnp.dtype(compute_dtype).itemsize
    out_dsize = jnp.dtype(out_dtype).itemsize
    if tm is None:
        tm = _pick_tm(n_rows, feat, in_dsize, out_dsize)

    # Pad the (packed) batch to a multiple of tm; padded rows are discarded.
    n_pad = pl.cdiv(n_rows, tm) * tm
    if n_pad != n_rows:
        xc = jnp.pad(xc, ((0, n_pad - n_rows), (0, 0)))

    grid = (n_pad // tm,)
    cost = pl.CostEstimate(
        flops=4 * B * c_in * hidden,
        transcendentals=0,
        bytes_accessed=(B * c_in * (in_dsize + out_dsize)
                        + (w1t.size + w2t.size) * in_dsize),
    )

    yp = pl.pallas_call(
        adapter_kernel,
        out_shape=jax.ShapeDtypeStruct((n_pad, feat), out_dtype),
        grid_spec=pltpu.PrefetchScalarGridSpec(
            num_scalar_prefetch=0,
            grid=grid,
            in_specs=[
                pl.BlockSpec((tm, feat), lambda i: (i, 0)),    # x tile
                pl.BlockSpec((feat, hid), lambda i: (0, 0)),   # W1.T (resident)
                pl.BlockSpec((hid, feat), lambda i: (0, 0)),   # W2.T (resident)
            ],
            out_specs=pl.BlockSpec((tm, feat), lambda i: (i, 0)),
        ),
        compiler_params=pltpu.CompilerParams(
            dimension_semantics=("parallel",)),
        cost_estimate=cost,
    )(xc, w1t, w2t)

    y = yp[:n_rows]
    if pack > 1:
        y = y.reshape(B, c_in)
    return y


def adapter_reference(x, w1, w2):
    h = jnp.maximum(x @ w1.T, 0.0)
    return jnp.maximum(h @ w2.T, 0.0)


if __name__ == "__main__":
    # Small shapes consistent with Adapter(c_in=64, reduction=4).
    B, c_in, reduction = 128, 64, 4
    hidden = c_in // reduction

    key = jax.random.PRNGKey(0)
    kx, k1, k2 = jax.random.split(key, 3)

    x = jax.random.normal(kx, (B, c_in), dtype=jnp.float32)
    # Deterministic Kaiming-uniform-like init (shapes from nn.Linear(..., bias=False)).
    bound1 = 1.0 / (c_in ** 0.5)
    bound2 = 1.0 / (hidden ** 0.5)
    w1 = jax.random.uniform(k1, (hidden, c_in), minval=-bound1, maxval=bound1,
                            dtype=jnp.float32)
    w2 = jax.random.uniform(k2, (c_in, hidden), minval=-bound2, maxval=bound2,
                            dtype=jnp.float32)

    ref = adapter_reference(x, w1, w2)

    # Default (f32 compute) path: exact-semantics check against the reference.
    out_f32 = jax.block_until_ready(adapter_forward(x, w1, w2))
    assert out_f32.shape == (B, c_in)
    assert jnp.allclose(out_f32, ref, atol=1e-4, rtol=1e-4), "f32 mismatch vs reference"

    # bf16 compute path (bandwidth-optimized); mixed-precision tolerance.
    out_bf16 = jax.block_until_ready(
        adapter_forward(x, w1, w2, compute_dtype=jnp.bfloat16))
    assert out_bf16.shape == (B, c_in)
    assert jnp.allclose(out_bf16, ref, atol=3e-2, rtol=3e-2), "bf16 mismatch vs reference"

    print("KERNEL_OK")
</pallas_src>

<mosaic_0001>
module attributes {stable_mosaic.version = 11 : i64} {
  func.func @adapter_kernel(%arg0: i32, %arg1: memref<32x128xf32, #tpu.memory_space<vmem>>, %arg2: memref<128x32xf32, #tpu.memory_space<vmem>>, %arg3: memref<32x128xf32, #tpu.memory_space<vmem>>, %arg4: memref<32x128xf32, #tpu.memory_space<vmem>>) attributes {dimension_semantics = [#tpu.dimension_semantics<parallel>], iteration_bounds = array<i64: 2>, scalar_prefetch = 0 : i64, scratch_operands = 0 : i64, tpu.core_type = #tpu.core_type<tc>, window_params = [{transform_indices = @transform_0, window_bounds = array<i64: 32, 128>}, {pipeline_mode = #tpu.pipeline_mode<synchronous>, transform_indices = @transform_1, window_bounds = array<i64: 128, 32>}, {pipeline_mode = #tpu.pipeline_mode<synchronous>, transform_indices = @transform_2, window_bounds = array<i64: 32, 128>}, {transform_indices = @transform_3, window_bounds = array<i64: 32, 128>}]} {
    %c0 = arith.constant 0 : index
    %c0_0 = arith.constant 0 : index
    %0 = vector.load %arg1[%c0, %c0_0] : memref<32x128xf32, #tpu.memory_space<vmem>>, vector<32x128xf32>
    %c0_1 = arith.constant 0 : index
    %c0_2 = arith.constant 0 : index
    %1 = vector.load %arg2[%c0_1, %c0_2] : memref<128x32xf32, #tpu.memory_space<vmem>>, vector<128x32xf32>
    %cst = arith.constant dense<0.000000e+00> : vector<32x32xf32>
    %2 = tpu.matmul %0, %1, %cst {dimension_numbers = #tpu.dot_dimension_numbers<[1], [0], [0], [1], [0, 0, 1, 1], [], []>} : vector<32x128xf32>, vector<128x32xf32>, vector<32x32xf32> -> vector<32x32xf32>
    %cst_3 = arith.constant 0.000000e+00 : f32
    %3 = vector.broadcast %cst_3 : f32 to vector<32x32xf32>
    %4 = arith.maximumf %2, %3 : vector<32x32xf32>
    %c0_4 = arith.constant 0 : index
    %c0_5 = arith.constant 0 : index
    %5 = vector.load %arg3[%c0_4, %c0_5] : memref<32x128xf32, #tpu.memory_space<vmem>>, vector<32x128xf32>
    %cst_6 = arith.constant dense<0.000000e+00> : vector<32x128xf32>
    %6 = tpu.matmul %4, %5, %cst_6 {dimension_numbers = #tpu.dot_dimension_numbers<[1], [0], [0], [1], [0, 0, 1, 1], [], []>} : vector<32x32xf32>, vector<32x128xf32>, vector<32x128xf32> -> vector<32x128xf32>
    %cst_7 = arith.constant 0.000000e+00 : f32
    %7 = vector.broadcast %cst_7 : f32 to vector<32x128xf32>
    %8 = arith.maximumf %6, %7 : vector<32x128xf32>
    %c0_8 = arith.constant 0 : index
    %c0_9 = arith.constant 0 : index
    %9 = vector.load %arg4[%c0_8, %c0_9] : memref<32x128xf32, #tpu.memory_space<vmem>>, vector<32x128xf32>
    tpu.vector_store %arg4[%c0_8, %c0_9], %8 {strides = array<i32>} : memref<32x128xf32, #tpu.memory_space<vmem>>, vector<32x128xf32>,
    return
  }
  func.func @transform_0(%arg0: i32) -> (i32, i32) {
    %c0_i32 = arith.constant 0 : i32
    %c0_i32_0 = arith.constant 0 : i32
    return %arg0, %c0_i32 : i32, i32
  }
  func.func @transform_1(%arg0: i32) -> (i32, i32) {
    %c0_i32 = arith.constant 0 : i32
    %c0_i32_0 = arith.constant 0 : i32
    %c0_i32_1 = arith.constant 0 : i32
    return %c0_i32, %c0_i32_0 : i32, i32
  }
  func.func @transform_2(%arg0: i32) -> (i32, i32) {
    %c0_i32 = arith.constant 0 : i32
    %c0_i32_0 = arith.constant 0 : i32
    %c0_i32_1 = arith.constant 0 : i32
    return %c0_i32, %c0_i32_0 : i32, i32
  }
  func.func @transform_3(%arg0: i32) -> (i32, i32) {
    %c0_i32 = arith.constant 0 : i32
    %c0_i32_0 = arith.constant 0 : i32
    return %arg0, %c0_i32 : i32, i32
  }
}

</mosaic_0001>

<bundles_post_ra>
// kernel: tpu_custom_call.1
= control target key start
LH: loop header
LB: loop body
LE: loop exit
PB: predicated region body
PF: predicated region fallthrough
CT: control target
= control target key end

     0   :  { %8 = vsyncpa [#allocation3], 0  ;;  %s857_s0 = inlined_call_operand.vmem [shape: f32[64,128], index: 0, kind: input, shape index: {}]   ;;  %s858_s1 = inlined_call_operand.vmem [shape: f32[128,32], index: 1, kind: input, shape index: {}]   ;;  %s859_s2 = inlined_call_operand.vmem [shape: f32[32,128], index: 2, kind: input, shape index: {}]   ;;  %s860_s3 = inlined_call_operand.hbm [shape: f32[64,128], index: 3, kind: output, shape index: {}]  }
   0x1   :  { %10 = vsyncpa [#allocation3 + $0x1], 0  ;;  %s690_s12 = smov 0   ;;  %s692_s13 = smov 0  }
   0x2   :  { %s694_s14 = smov 0   ;;  %s696_s15 = smov 0  }
   0x3 LB: > { %s711_s16 = sadd.s32 4294967295, %s665_s15   ;;  %s467_s17 = sadd.s32 4294967294, %s665_s15   ;;  %s665_s15 = sphi %s696_s15, %s866_s15   ;;  %s661_s14 = sphi %s694_s14, %s865_s14   ;;  %s657_s13 = sphi %s692_s13, %s864_s13   ;;  %s653_s12 = sphi %s690_s12, %s863_s12  }
   0x4   : > { %s715_s18 = sadd.s32 1, %s665_s15   ;;  %s91_s19 = sadd.s32 1, %s661_s14 }
   0x5   : > { %s88_s20 = ssub.s32 %s665_s15, %s715_s18  ;;  %p101_p0 = scmp.ne.s32.totalorder %s661_s14, %s657_s13 }
   0x6   : > { %p89_p1 = scmp.eq.s32.totalorder %s88_s20, 0  ;;  %p102_p2 = scmp.eq.s32.totalorder %s711_s16, 1 }
   0x7   : > { %p107_p3 = scmp.ne.s32.totalorder %s657_s13, %s653_s12  ;;  %p108_p4 = scmp.eq.s32.totalorder %s467_s17, 1 }
   0x8   : > { %s726_s21 = scalar_select %p89_p1, %s661_s14, %s91_s19  }
   0x9   : > { %p728_p5 = por %p102_p2, %p101_p0  ;;  %p732_p6 = por %p108_p4, %p107_p3 }
   0xa   : > { %p470_p7 = scmp.ge.s32.totalorder %s665_s15, 1  ;;  %p141_p8 = scmp.lt.s32.totalorder %s665_s15, 3 }
   0xc   : > { %p142_p9 = pnand %p470_p7, %p141_p8 }
   0xd   : > { %s472_s28 = sshll.u32 (!%p142_p9), %s711_s16, 2  ;;  %s483_s10 = sshll.u32 (!%p142_p9), %s711_s16, 9 }
   0xe   : > { %145 = sbr.rel (%p142_p9) target bundleno = 465 (0x1d1), region = 32  ;;  %p166_p10 = scmp.lt.s32.totalorder (!%p142_p9), %s472_s28, 7 }
   0xf   : > { %s815_s20 = scalar_lea.hbm (!%p142_p9), %s860_s3, %s483_s10  ;;  %s667_s25 = smov (!%p142_p9), [#allocation2]  }
  0x10   : > { %s609_s26 = sshll.u32 (!%p142_p9), %s667_s25, 4  ;;  %s610_s26 = int_to_ptr.vmem [resolvable:$false] %s609_s26 }
  0x11   : > { %s611_s27 = scalar_lea.vmem (!%p142_p9), %s610_s26, 1024 }
  0x13   : > { %v191_v0 = vld [vmem:[%s858_s1 + $0x78] sm:$0xff]  ;;  %v190_v1 = vld [vmem:[%s858_s1 + $0x70] sm:$0xff]  ;;  %v189_v2 = vld [vmem:[%s858_s1 + $0x68] sm:$0xff]  ;;  %s868_s28 = smov (!%p166_p10, %s472_s28), 7  ;;  %vm285_vm0 = vcmask 261120  }
  0x14   : > { %512 = vmatprep.subr.mxu0 %v191_v0  ;;  %v188_v3 = vld [vmem:[%s858_s1 + $0x60] sm:$0xff]  ;;  %s473_s6 = sshll.u32 %s868_s28, 3  ;;  %v284_v4 = vld [vmem:[%s859_s2 + $0x18] sm:$0xff]  ;;  %v186_v7 = vld [vmem:[%s858_s1 + $0x50] sm:$0xff] }
  0x15   : > { %513 = vmatpush3.msra.mxu0 %v191_v0  ;;  %v187_v5 = vld [vmem:[%s858_s1 + $0x58] sm:$0xff]  ;;  %s760_s19 = scalar_lea.vmem %s857_s0, %s473_s6  ;;  %550 = vmatprep.subr.mxu1 %v284_v4  ;;  %v185_v8 = vld [vmem:[%s858_s1 + $0x48] sm:$0xff]  ;;  %v184_v9 = vld [vmem:[%s858_s1 + $0x40] sm:$0xff] }
  0x16   : > { %514 = vmatprep.subr.mxu0 %v190_v1  ;;  %v172_v6 = vld [vmem:[%s760_s19] sm:$0xff]  ;;  %551 = vmatpush3.msra.mxu1 %v284_v4  ;;  %v183_v10 = vld [vmem:[%s858_s1 + $0x38] sm:$0xff]  ;;  %v182_v11 = vld [vmem:[%s858_s1 + $0x30] sm:$0xff] }
  0x17   : > { %515 = vmatpush3.msra.mxu0 %v190_v1  ;;  %544 = vmatprep.mubr.f32.mxu0 %v172_v6  ;;  %v181_v12 = vld [vmem:[%s858_s1 + $0x28] sm:$0xff]  ;;  %v180_v13 = vld [vmem:[%s858_s1 + $0x20] sm:$0xff]  ;;  %v179_v14 = vld [vmem:[%s858_s1 + $0x18] sm:$0xff] }
  0x18   : > { %516 = vmatprep.subr.mxu0 %v189_v2  ;;  %v178_v15 = vld [vmem:[%s858_s1 + $0x10] sm:$0xff]  ;;  %v177_v16 = vld [vmem:[%s858_s1 + $0x8] sm:$0xff]  ;;  %v176_v17 = vld [vmem:[%s858_s1] sm:$0xff] }
  0x19   : > { %517 = vmatpush3.msra.mxu0 %v189_v2  ;;  %v173_v18 = vld [vmem:[%s760_s19 + $0x8] sm:$0xff]  ;;  %v174_v19 = vld [vmem:[%s760_s19 + $0x10] sm:$0xff]  ;;  %v175_v20 = vld [vmem:[%s760_s19 + $0x18] sm:$0xff]  ;;  %s162_s19 = sand.u32 1, %s657_s13  }
  0x1a   : > { %518 = vmatprep.subr.mxu0 %v188_v3  ;;  %v283_v21 = vld [vmem:[%s859_s2 + $0x10] sm:$0xff]  ;;  %v282_v22 = vld [vmem:[%s859_s2 + $0x8] sm:$0xff]  ;;  %v281_v23 = vld [vmem:[%s859_s2] sm:$0xff]  ;;  %s471_s7 = sshll.u32 %s162_s19, 5  ;;  %s817_s24 = scalar_lea.sflag [#allocation3], %s162_s19 }
  0x1b   : > { %519 = vmatpush3.msra.mxu0 %v188_v3  ;;  %552 = vmatprep.subr.mxu1 %v283_v21  ;;  %s164_s8 = scalar_lea.vmem [#allocation2], %s471_s7 }
  0x1c   : > { %520 = vmatprep.subr.mxu0 %v187_v5  ;;  %553 = vmatpush3.msra.mxu1 %v283_v21  ;;  %s405_s9 = sshll.u32 %s164_s8, 4  ;;  %s810_s9 = int_to_ptr.vmem [resolvable:$true] %s405_s9 }
  0x1d   : > { %521 = vmatpush3.msra.mxu0 %v187_v5  ;;  %554 = vmatprep.subr.mxu1 %v282_v22  ;;  %s605_s16 = scalar_lea.vmem %s810_s9, 512  ;;  %p612_p0 = scmp.lt.s32.totalorder %s810_s9, %s610_s26 }
  0x1e   : > { %522 = vmatprep.subr.mxu0 %v186_v7  ;;  %555 = vmatpush3.msra.mxu1 %v282_v22  ;;  %p606_p11 = scmp.ne.s32.totalorder %s810_s9, %s605_s16  ;;  %p613_p1 = scmp.lt.s32.totalorder %s611_s27, %s605_s16 }
  0x1f   : > { %523 = vmatpush3.msra.mxu0 %v186_v7  ;;  %556 = vmatprep.subr.mxu1 %v281_v23 }
  0x20   : > { %524 = vmatprep.subr.mxu0 %v185_v8  ;;  %557 = vmatpush3.msra.mxu1 %v281_v23  ;;  %p607_p12 = pnand %p606_p11, %p728_p5  ;;  %p614_p2 = por %p613_p1, %p612_p0 }
  0x21   : > { %525 = vmatpush3.msra.mxu0 %v185_v8 }
  0x22   : > { %526 = vmatprep.subr.mxu0 %v184_v9  ;;  %p608_p13 = pneg %p607_p12 }
  0x23   : > { %527 = vmatpush3.msra.mxu0 %v184_v9 }
  0x24   : > { %528 = vmatprep.subr.mxu0 %v183_v10  ;;  %p615_p3 = pnand %p614_p2, %p608_p13 }
  0x25   : > { %529 = vmatpush3.msra.mxu0 %v183_v10 }
  0x26   : > { %530 = vmatprep.subr.mxu0 %v182_v11 }
  0x27   : > { %531 = vmatpush3.msra.mxu0 %v182_v11 }
  0x28   : > { %532 = vmatprep.subr.mxu0 %v181_v12 }
  0x29   : > { %533 = vmatpush3.msra.mxu0 %v181_v12 }
  0x2a   : > { %534 = vmatprep.subr.mxu0 %v180_v13 }
  0x2b   : > { %535 = vmatpush3.msra.mxu0 %v180_v13 }
  0x2c   : > { %536 = vmatprep.subr.mxu0 %v179_v14 }
  0x2d   : > { %537 = vmatpush3.msra.mxu0 %v179_v14 }
  0x2e   : > { %538 = vmatprep.subr.mxu0 %v178_v15 }
  0x2f   : > { %539 = vmatpush3.msra.mxu0 %v178_v15 }
  0x30   : > { %540 = vmatprep.subr.mxu0 %v177_v16 }
  0x31   : > { %541 = vmatpush3.msra.mxu0 %v177_v16 }
  0x32   : > { %542 = vmatprep.subr.mxu0 %v176_v17 }
  0x33   : > { %543 = vmatpush3.msra.mxu0 %v176_v17 }
  0x34   : > { %545 = vmatmul.mubr.f32.vlgmr.msra.gmra.mxu0 %v173_v18 }
  0x35   : > { %547 = vmatprep.mubr.f32.mxu0 %v174_v19 }
  0x38   : > { %548 = vmatmul.mubr.f32.gmra.mxu0 %v175_v20 }
  0xf4   : > { %v546_v24 = vpop.f32.mrf.mxu0 }
  0xf5   : > { %v278_v27 = vmax.f32 %v546_v24, 0.0 }
  0xf6   : > { %v258_v25 = vpop.f32.mrf.mxu0 }
  0xf7   : > { %v277_v26 = vmax.f32 %v258_v25, 0.0 }
  0xf8   : > { %v549_v28 = vpop.f32.mrf.mxu0 }
  0xf9   : > { %558 = vmatprep.mubr.msk.f32.mxu1 %vm285_vm0, %v277_v26  ;;  %v280_v31 = vmax.f32 %v549_v28, 0.0 }
  0xfa   : > { %v268_v29 = vpop.f32.mrf.mxu0  ;;  %559 = vmatmul.mubr.msk.f32.vlgmr.msra.gmra.mxu1 %vm285_vm0, %v278_v27 }
  0xfb   : > { %v279_v30 = vmax.f32 %v268_v29, 0.0 }
  0xfd   : > { %561 = vmatprep.mubr.msk.f32.mxu1 %vm285_vm0, %v279_v30 }
  0xfe   : > { %562 = vmatmul.mubr.msk.f32.gmra.mxu1 %vm285_vm0, %v280_v31 }
 0x1ba   : > { %v560_v32 = vpop.f32.mrf.mxu1 }
 0x1bb   : > { %v384_v33 = vmax.f32 %v560_v32, 0.0 }
 0x1bc   : > { %v364_v34 = vpop.f32.mrf.mxu1 }
 0x1bd   : > { %388 = vst [vmem:[%s164_s8 + $0x8] sm:$0xff] %v384_v33  ;;  %v383_v35 = vmax.f32 %v364_v34, 0.0 }
 0x1be   : > { %v563_v36 = vpop.f32.mrf.mxu1 }
 0x1bf   : > { %387 = vst [vmem:[%s164_s8] sm:$0xff] %v383_v35  ;;  %v386_v37 = vmax.f32 %v563_v36, 0.0 }
 0x1c0   : > { %v374_v38 = vpop.f32.mrf.mxu1 }
 0x1c1   : > { %390 = vst [vmem:[%s164_s8 + $0x18] sm:$0xff] %v386_v37  ;;  %v385_v39 = vmax.f32 %v374_v38, 0.0 }
 0x1c3   : > { %389 = vst [vmem:[%s164_s8 + $0x10] sm:$0xff] %v385_v39 }
 0x1c4   : > { %618 = shalt.err (!%p615_p3)
}
 0x1c5   : > { %s619_s28 = scalar_lea.hbm %s815_s20, 512  ;;  %s623_s4 = scalar_lea.hbm %s860_s3, 1024 }
 0x1c6   : > { %p620_p4 = scmp.ne.s32.totalorder %s815_s20, %s619_s28  ;;  %p624_p9 = scmp.lt.s32.totalorder %s815_s20, %s860_s3 }
 0x1c7   : > { %p625_p10 = scmp.lt.s32.totalorder %s623_s4, %s619_s28 }
 0x1c8   : > { %p621_p7 = pnand %p620_p4, %p728_p5 }
 0x1c9   : > { %p626_p11 = por %p625_p10, %p624_p9 }
 0x1ca   : > { %p622_p8 = pneg %p621_p7 }
 0x1cc   : > { %p627_p12 = pnand %p626_p11, %p622_p8 }
 0x1ce   : > { %630 = shalt.err (!%p627_p12)
}
 0x1cf   : > { %s668_s19 = smov 128   ;;  %s669_s7 = smov 8  }
 0x1d0   : > { %564 = dma.vmem_to_hbm [thread:$0]  (%p728_p5), %s810_s9, 512, %s815_s20, %s817_s24, %s668_s19, %s668_s19, %s669_s7  }
 0x1d1 PF: > { %p570_p13 = scmp.ge.s32.totalorder %s665_s15, 2  ;;  %s420_s8 = sand.u32 1, %s653_s12  }
 0x1d2   : > { %s421_s10 = scalar_lea.sflag [#allocation3], %s420_s8 }
 0x1d3   : > { %p567_p0 = pnand %p570_p13, %p732_p6 }
 0x1d5   : > { %p568_p1 = pneg %p567_p0 }
 0x1d7   : > { %648 = dma.done.wait (%p568_p1), %s421_s10, 512  }
 0x1d8   : > { %650 = vsyncadd (%p568_p1), %s421_s10, 4294966784  ;;  %p13_p2 = scmp.ge.s32.totalorder %s715_s18, 4   ;;  %s863_s12 = smov %s657_s13 }
 0x1d9   : > { %s864_s13 = smov %s661_s14  ;;  %s865_s14 = smov %s726_s21 }
 0x1da   : > { %s866_s15 = smov %s715_s18  ;;  %15 = sbr.rel (!%p13_p2) target bundleno = 3 (0x3), region = 67 }
 0x1df   :  { %426 = vsyncpa [#allocation3], 1 }
 0x1e0   :  { %428 = vsyncpa [#allocation3 + $0x1], 1 }

</bundles_post_ra>
